<compile_context>
chip_gen: v7x
topology: tpu7x:2x2x1
jax: 0.10.0
libtpu: 0.0.40
codegen_flags: <defaults>
</compile_context>

<pallas_src>
import jax
import jax.numpy as jnp
from jax.experimental import pallas as pl
from jax.experimental.pallas import tpu as pltpu


# Constant divisors from the PyTorch source, folded into multipliers at build time
# (avoids runtime divides by constants; ~1 ulp difference vs an exact divide).
_INV_0037 = 1.0 / 0.037233025
_INV_0730 = 1.0 / 0.7301285


# ---------------------------------------------------------------------------
# Kernel
# ---------------------------------------------------------------------------
def flocking_kernel(hT_ref, src_ref, tgt_ref, pred_ref):
    f32 = jnp.float32
    hT = hT_ref[...]                      # [4, N]  node features, nodes on lanes
    src = src_ref[...]                    # [1, E]  edge source j (lane-major)
    tgt = tgt_ref[...]                    # [1, E]  edge target i (lane-major)
    N = hT.shape[1]
    E = src.shape[1]

    # --- one shared iota; two one-hots (the target one-hot is reused by the scatter) ----
    node_id = jax.lax.broadcasted_iota(jnp.int32, (N, E), 0)          # [N, E]
    onehot_tgt = (node_id == tgt).astype(f32)                         # [N, E]
    onehot_src = (node_id == src).astype(f32)                         # [N, E]

    # --- gather h_i / h_j: two [4,N] x [N,E] MXU matmuls (exact: one 1 per column) ------
    h_i = jnp.dot(hT, onehot_tgt, preferred_element_type=f32)         # [4, E]
    h_j = jnp.dot(hT, onehot_src, preferred_element_type=f32)         # [4, E]

    # --- message() on lane-dense [1, E] rows (Python-scalar constants only) -------------
    hi0, hi1 = h_i[0:1, :], h_i[1:2, :]
    hj0, hj1 = h_j[0:1, :], h_j[1:2, :]
    d40 = hj0 - hi0                       # x4 - x0
    d15 = hi1 - hj1                       # x1 - x5
    m0 = (d40 + d15 * 0.40914905) * 0.028998906
    m1 = (d40 + d15 * 0.5819344) * -0.02637788
    # m2 = (x1 * -0.07907551 - (x4 - x0)) * -0.026721993  -> scatter-adds into aggr_out[:,0]
    #      which update() never reads (x4 is unused); dead code, output unchanged.
    m3 = (hi1 * 0.95594215 - hj1 - hi0 * 0.20244296 - hj0 * -0.17809269) * 0.026933579

    # --- exact h_i == h_j zero-mask (VPU compare + 3 maxes; no MXU reduce) --------------
    h_dif = h_i - h_j                                                 # [4, E] exact
    nz = (h_dif != 0.0).astype(f32)
    keep = jnp.maximum(jnp.maximum(nz[0:1, :], nz[1:2, :]),
                       jnp.maximum(nz[2:3, :], nz[3:4, :]))           # [1, E] in {0, 1}

    # --- fused scatter: sum(mean_in) + add(coll[1]) + in-degree count, one contraction --
    rhs_scatter = jnp.concatenate(
        [m0 * keep, m1 * keep, m3 * keep, jnp.ones_like(keep)], axis=0)   # [4, E]
    agg = jax.lax.dot_general(rhs_scatter, onehot_tgt,
                              (((1,), (1,)), ((), ())),
                              preferred_element_type=f32)             # [4, N]

    count = jnp.maximum(agg[3:4, :], 1.0)                             # [1, N] (masked edges count too)
    inv_count = 1.0 / count               # tiny [1,N] divide; lowers everywhere
    a5 = agg[2:3, :]                      # scatter-add of coll[1]
    a6 = agg[0:1, :] * inv_count          # scatter-mean of mean_in[0]
    a7 = agg[1:2, :] * inv_count          # scatter-mean of mean_in[1]

    # --- update() + prediction head on lane-dense [1, N] rows ---------------------------
    hx0, hx1, hx2, hx3 = hT[0:1, :], hT[1:2, :], hT[2:3, :], hT[3:4, :]
    u0 = (hx1 + a7 * _INV_0037) * -0.0020586958
    u1 = ((hx0 - a7 * a7 * a5) * 0.015168043 - a6) * -0.10450508
    u2 = (a7 - hx1 * 0.027931638 + a6) * 0.075265266
    u3 = (hx3 * hx3 - a6 + hx2 - hx3 + a7 * -0.33928046) * -0.08554904
    p0 = (u0 + u3 + u0) * -0.24326763 - u1 * _INV_0730 - u2 * 1.1234615
    p1 = u2 - (u1 + u0) + u3
    pred_ref[...] = jnp.concatenate([p0, p1], axis=0)                 # [2, N] lane-dense store


# ---------------------------------------------------------------------------
# Generation-aware VMEM limit derived from actual intermediate sizes.
# ---------------------------------------------------------------------------
def _round_up(x, m):
    return ((x + m - 1) // m) * m


def _vmem_limit_bytes(n_nodes, n_edges):
    n_sub = _round_up(max(n_nodes, 8), 8)          # N on sublanes (one-hots)
    n_lane = _round_up(max(n_nodes, 128), 128)     # N on lanes (node-side rows)
    e_lane = _round_up(max(n_edges, 128), 128)     # E on lanes (edge-side rows)
    onehots = 2 * 4 * n_sub * e_lane                           # tgt + src one-hots (f32)
    edge_interm = 16 * 4 * 8 * e_lane                          # h_i/h_j/msg/mask rows (padded)
    node_interm = 12 * 4 * 8 * n_lane                          # agg / update / head rows
    io_bufs = 2 * (2 * 4 * 8 * n_lane + 2 * 4 * 8 * e_lane)    # double-buffered in/out blocks
    est = onehots + edge_interm + node_interm + io_bufs
    limit = min(max(2 * est, 32 * 1024 * 1024), 96 * 1024 * 1024)
    try:  # cap by the physical VMEM of this chip generation when queryable
        phys = getattr(pltpu.get_tpu_info(), "vmem_capacity_bytes", None)
        if phys:
            limit = min(limit, int(phys * 0.85))
    except Exception:
        limit = min(limit, 56 * 1024 * 1024)       # conservative (v7x has 64 MiB / TC)
    return limit


# ---------------------------------------------------------------------------
# Wrapper
# ---------------------------------------------------------------------------
def flocking_forward(pos, vel, edge_index):
    """pos, vel: [N, 2] f32; edge_index: [2, E] int (PyG convention: row0 = src j, row1 = tgt i)."""
    h = jnp.concatenate([pos, vel], axis=-1).astype(jnp.float32)      # [N, 4]
    hT = h.T                                                          # [4, N] lane-dense nodes
    src = edge_index[0].reshape(1, -1).astype(jnp.int32)              # [1, E] lane-major
    tgt = edge_index[1].reshape(1, -1).astype(jnp.int32)              # [1, E] lane-major
    N = h.shape[0]
    E = src.shape[1]

    # Advisory cost hint for the XLA scheduler around the custom call.
    cost = pl.CostEstimate(
        flops=2 * 4 * N * E * 2      # two gather matmuls
        + 2 * 4 * N * E              # fused scatter contraction
        + 60 * E + 40 * N,           # lane-dense VPU message/mask/update/head
        transcendentals=0,
        bytes_accessed=4 * (4 * N + 2 * E + 2 * N))

    predT = pl.pallas_call(
        flocking_kernel,
        out_shape=jax.ShapeDtypeStruct((2, N), jnp.float32),
        grid=(1,),                                         # single TC does everything; no
        in_specs=[                                         # per-tile recompute of edge work
            pl.BlockSpec((4, N), lambda i: (0, 0)),        # hT (all nodes, resident)
            pl.BlockSpec((1, E), lambda i: (0, 0)),        # edge sources j
            pl.BlockSpec((1, E), lambda i: (0, 0)),        # edge targets i
        ],
        out_specs=pl.BlockSpec((2, N), lambda i: (0, 0)),  # lane-dense prediction
        compiler_params=pltpu.CompilerParams(
            dimension_semantics=("arbitrary",),
            vmem_limit_bytes=_vmem_limit_bytes(N, E)),
        cost_estimate=cost,
    )(hT, src, tgt)
    return predT.T                                         # [N, 2]


# ---------------------------------------------------------------------------
# Pure-JAX reference reproducing the PyTorch/PyG semantics (for verification).
# ---------------------------------------------------------------------------
def reference_forward(pos, vel, edge_index):
    h = jnp.concatenate([pos, vel], axis=-1).astype(jnp.float32)
    N = h.shape[0]
    src = edge_index[0]
    tgt = edge_index[1]
    h_j = h[src]
    h_i = h[tgt]
    x0, x1, x2, x3 = (h_i[:, k:k + 1] for k in range(4))
    x4, x5, x6, x7 = (h_j[:, k:k + 1] for k in range(4))
    m0 = (x4 - x0 + (x1 - x5) * 0.40914905) * 0.028998906
    m1 = (x4 - x0 + (x1 - x5) * 0.5819344) * -0.02637788
    m2 = (x1 * -0.07907551 - (x4 - x0)) * -0.026721993
    m3 = (x1 * 0.95594215 - x5 - x0 * 0.20244296 - x4 * -0.17809269) * 0.026933579
    msg = jnp.concatenate([m0, m1, m2, m3], axis=1)
    mask = jnp.all((h_i - h_j) == 0.0, axis=1, keepdims=True)
    msg = jnp.where(mask, 0.0, msg)
    mean_in, coll = msg[:, 0:2], msg[:, 2:4]
    add_out = jnp.zeros((N, 2), jnp.float32).at[tgt].add(coll)
    sum_mean = jnp.zeros((N, 2), jnp.float32).at[tgt].add(mean_in)
    count = jnp.zeros((N,), jnp.float32).at[tgt].add(1.0)
    mean_out = sum_mean / jnp.maximum(count, 1.0)[:, None]
    aggr = jnp.concatenate([add_out, mean_out], axis=1)
    hx0, hx1, hx2, hx3 = (h[:, k:k + 1] for k in range(4))
    a4, a5, a6, a7 = (aggr[:, k:k + 1] for k in range(4))
    u0 = (hx1 + a7 / 0.037233025) * -0.0020586958
    u1 = ((hx0 - (a7 ** 2) * a5) * 0.015168043 - a6) * -0.10450508
    u2 = (a7 - hx1 * 0.027931638 + a6) * 0.075265266
    u3 = (hx3 ** 2 - a6 + hx2 - hx3 + a7 * -0.33928046) * -0.08554904
    p0 = (u0 + u3 + u0) * -0.24326763 - u1 / 0.7301285 - u2 * 1.1234615
    p1 = u2 - (u1 + u0) + u3
    return jnp.concatenate([p0, p1], axis=1)


if __name__ == "__main__":
    key = jax.random.PRNGKey(0)
    k_pos, k_vel = jax.random.split(key)

    N = 16                                   # number of agents / graph nodes
    pos = jax.random.normal(k_pos, (N, 2), jnp.float32)
    vel = jax.random.normal(k_vel, (N, 2), jnp.float32)

    # deterministic bidirectional ring graph: E = 32 edges, [2, E] (row0 = src, row1 = tgt)
    idx = jnp.arange(N, dtype=jnp.int32)
    nbr = (idx + 1) % N
    edge_index = jnp.stack(
        [jnp.concatenate([idx, nbr]), jnp.concatenate([nbr, idx])], axis=0
    )

    pred = jax.block_until_ready(flocking_forward(pos, vel, edge_index))
    ref = jax.block_until_ready(reference_forward(pos, vel, edge_index))

    assert pred.shape == (N, 2) and pred.dtype == jnp.float32
    # Tolerance covers MXU f32 accumulation and constant-reciprocal folding vs the
    # sequential scalar reference (observed error ~1e-6; real bugs would be >= 1e-2).
    assert jnp.allclose(pred, ref, atol=1e-4, rtol=1e-4), (pred, ref)

    print("KERNEL_OK")
</pallas_src>

<mosaic_0001>
module attributes {stable_mosaic.version = 11 : i64} {
  func.func @flocking_kernel(%arg0: i32, %arg1: memref<4x16xf32, #tpu.memory_space<vmem>>, %arg2: memref<1x32xi32, #tpu.memory_space<vmem>>, %arg3: memref<1x32xi32, #tpu.memory_space<vmem>>, %arg4: memref<2x16xf32, #tpu.memory_space<vmem>>) attributes {dimension_semantics = [#tpu.dimension_semantics<arbitrary>], iteration_bounds = array<i64: 1>, scalar_prefetch = 0 : i64, scratch_operands = 0 : i64, tpu.core_type = #tpu.core_type<tc>, window_params = [{pipeline_mode = #tpu.pipeline_mode<synchronous>, transform_indices = @transform_0, window_bounds = array<i64: 4, 16>}, {pipeline_mode = #tpu.pipeline_mode<synchronous>, transform_indices = @transform_1, window_bounds = array<i64: 1, 32>}, {pipeline_mode = #tpu.pipeline_mode<synchronous>, transform_indices = @transform_2, window_bounds = array<i64: 1, 32>}, {pipeline_mode = #tpu.pipeline_mode<synchronous>, transform_indices = @transform_3, window_bounds = array<i64: 2, 16>}]} {
    %c0 = arith.constant 0 : index
    %c0_0 = arith.constant 0 : index
    %0 = vector.load %arg1[%c0, %c0_0] : memref<4x16xf32, #tpu.memory_space<vmem>>, vector<4x16xf32>
    %c0_1 = arith.constant 0 : index
    %c0_2 = arith.constant 0 : index
    %1 = vector.load %arg2[%c0_1, %c0_2] : memref<1x32xi32, #tpu.memory_space<vmem>>, vector<1x32xi32>
    %c0_3 = arith.constant 0 : index
    %c0_4 = arith.constant 0 : index
    %2 = vector.load %arg3[%c0_3, %c0_4] : memref<1x32xi32, #tpu.memory_space<vmem>>, vector<1x32xi32>
    %3 = tpu.iota {dimensions = array<i32: 0>} : vector<16x32xi32>
    %4 = vector.broadcast %2 : vector<1x32xi32> to vector<16x32xi32>
    %5 = arith.cmpi eq, %3, %4 : vector<16x32xi32>
    %6 = arith.extui %5 : vector<16x32xi1> to vector<16x32xi32>
    %7 = arith.sitofp %6 : vector<16x32xi32> to vector<16x32xf32>
    %8 = vector.broadcast %1 : vector<1x32xi32> to vector<16x32xi32>
    %9 = arith.cmpi eq, %3, %8 : vector<16x32xi32>
    %10 = arith.extui %9 : vector<16x32xi1> to vector<16x32xi32>
    %11 = arith.sitofp %10 : vector<16x32xi32> to vector<16x32xf32>
    %cst = arith.constant dense<0.000000e+00> : vector<4x32xf32>
    %12 = tpu.matmul %0, %7, %cst {dimension_numbers = #tpu.dot_dimension_numbers<[1], [0], [0], [1], [0, 0, 1, 1], [], []>} : vector<4x16xf32>, vector<16x32xf32>, vector<4x32xf32> -> vector<4x32xf32>
    %cst_5 = arith.constant dense<0.000000e+00> : vector<4x32xf32>
    %13 = tpu.matmul %0, %11, %cst_5 {dimension_numbers = #tpu.dot_dimension_numbers<[1], [0], [0], [1], [0, 0, 1, 1], [], []>} : vector<4x16xf32>, vector<16x32xf32>, vector<4x32xf32> -> vector<4x32xf32>
    %14 = vector.extract_strided_slice %12 {offsets = [0, 0], sizes = [1, 32], strides = [1, 1]} : vector<4x32xf32> to vector<1x32xf32>
    %15 = vector.extract_strided_slice %12 {offsets = [1, 0], sizes = [1, 32], strides = [1, 1]} : vector<4x32xf32> to vector<1x32xf32>
    %16 = vector.extract_strided_slice %13 {offsets = [0, 0], sizes = [1, 32], strides = [1, 1]} : vector<4x32xf32> to vector<1x32xf32>
    %17 = vector.extract_strided_slice %13 {offsets = [1, 0], sizes = [1, 32], strides = [1, 1]} : vector<4x32xf32> to vector<1x32xf32>
    %18 = arith.subf %16, %14 : vector<1x32xf32>
    %19 = arith.subf %15, %17 : vector<1x32xf32>
    %cst_6 = arith.constant 0.409149051 : f32
    %20 = vector.broadcast %cst_6 : f32 to vector<1x32xf32>
    %21 = arith.mulf %19, %20 : vector<1x32xf32>
    %22 = arith.addf %18, %21 : vector<1x32xf32>
    %cst_7 = arith.constant 0.0289989058 : f32
    %23 = vector.broadcast %cst_7 : f32 to vector<1x32xf32>
    %24 = arith.mulf %22, %23 : vector<1x32xf32>
    %cst_8 = arith.constant 0.581934392 : f32
    %25 = vector.broadcast %cst_8 : f32 to vector<1x32xf32>
    %26 = arith.mulf %19, %25 : vector<1x32xf32>
    %27 = arith.addf %18, %26 : vector<1x32xf32>
    %cst_9 = arith.constant -0.0263778791 : f32
    %28 = vector.broadcast %cst_9 : f32 to vector<1x32xf32>
    %29 = arith.mulf %27, %28 : vector<1x32xf32>
    %cst_10 = arith.constant 0.955942153 : f32
    %30 = vector.broadcast %cst_10 : f32 to vector<1x32xf32>
    %31 = arith.mulf %15, %30 : vector<1x32xf32>
    %32 = arith.subf %31, %17 : vector<1x32xf32>
    %cst_11 = arith.constant 0.202442959 : f32
    %33 = vector.broadcast %cst_11 : f32 to vector<1x32xf32>
    %34 = arith.mulf %14, %33 : vector<1x32xf32>
    %35 = arith.subf %32, %34 : vector<1x32xf32>
    %cst_12 = arith.constant -0.178092688 : f32
    %36 = vector.broadcast %cst_12 : f32 to vector<1x32xf32>
    %37 = arith.mulf %16, %36 : vector<1x32xf32>
    %38 = arith.subf %35, %37 : vector<1x32xf32>
    %cst_13 = arith.constant 0.0269335788 : f32
    %39 = vector.broadcast %cst_13 : f32 to vector<1x32xf32>
    %40 = arith.mulf %38, %39 : vector<1x32xf32>
    %41 = arith.subf %12, %13 : vector<4x32xf32>
    %cst_14 = arith.constant 0.000000e+00 : f32
    %42 = vector.broadcast %cst_14 : f32 to vector<4x32xf32>
    %43 = arith.cmpf one, %41, %42 : vector<4x32xf32>
    %44 = arith.extui %43 : vector<4x32xi1> to vector<4x32xi32>
    %45 = arith.sitofp %44 : vector<4x32xi32> to vector<4x32xf32>
    %46 = vector.extract_strided_slice %45 {offsets = [0, 0], sizes = [1, 32], strides = [1, 1]} : vector<4x32xf32> to vector<1x32xf32>
    %47 = vector.extract_strided_slice %45 {offsets = [1, 0], sizes = [1, 32], strides = [1, 1]} : vector<4x32xf32> to vector<1x32xf32>
    %48 = arith.maximumf %46, %47 : vector<1x32xf32>
    %49 = vector.extract_strided_slice %45 {offsets = [2, 0], sizes = [1, 32], strides = [1, 1]} : vector<4x32xf32> to vector<1x32xf32>
    %50 = vector.extract_strided_slice %45 {offsets = [3, 0], sizes = [1, 32], strides = [1, 1]} : vector<4x32xf32> to vector<1x32xf32>
    %51 = arith.maximumf %49, %50 : vector<1x32xf32>
    %52 = arith.maximumf %48, %51 : vector<1x32xf32>
    %53 = arith.mulf %24, %52 : vector<1x32xf32>
    %54 = arith.mulf %29, %52 : vector<1x32xf32>
    %55 = arith.mulf %40, %52 : vector<1x32xf32>
    %cst_15 = arith.constant 1.000000e+00 : f32
    %56 = vector.broadcast %cst_15 : f32 to vector<1x32xf32>
    %57 = tpu.concatenate %53, %54, %55, %56 in 0 : vector<1x32xf32>, vector<1x32xf32>, vector<1x32xf32>, vector<1x32xf32> -> vector<4x32xf32>
    %cst_16 = arith.constant dense<0.000000e+00> : vector<4x16xf32>
    %58 = tpu.matmul %57, %7, %cst_16 {dimension_numbers = #tpu.dot_dimension_numbers<[1], [1], [0], [0], [0, 0, 1, 0], [], []>} : vector<4x32xf32>, vector<16x32xf32>, vector<4x16xf32> -> vector<4x16xf32>
    %59 = vector.extract_strided_slice %58 {offsets = [3, 0], sizes = [1, 16], strides = [1, 1]} : vector<4x16xf32> to vector<1x16xf32>
    %cst_17 = arith.constant 1.000000e+00 : f32
    %60 = vector.broadcast %cst_17 : f32 to vector<1x16xf32>
    %61 = arith.maximumf %59, %60 : vector<1x16xf32>
    %cst_18 = arith.constant 1.000000e+00 : f32
    %62 = vector.broadcast %cst_18 : f32 to vector<1x16xf32>
    %63 = arith.divf %62, %61 : vector<1x16xf32>
    %64 = vector.extract_strided_slice %58 {offsets = [2, 0], sizes = [1, 16], strides = [1, 1]} : vector<4x16xf32> to vector<1x16xf32>
    %65 = vector.extract_strided_slice %58 {offsets = [0, 0], sizes = [1, 16], strides = [1, 1]} : vector<4x16xf32> to vector<1x16xf32>
    %66 = arith.mulf %65, %63 : vector<1x16xf32>
    %67 = vector.extract_strided_slice %58 {offsets = [1, 0], sizes = [1, 16], strides = [1, 1]} : vector<4x16xf32> to vector<1x16xf32>
    %68 = arith.mulf %67, %63 : vector<1x16xf32>
    %69 = vector.extract_strided_slice %0 {offsets = [0, 0], sizes = [1, 16], strides = [1, 1]} : vector<4x16xf32> to vector<1x16xf32>
    %70 = vector.extract_strided_slice %0 {offsets = [1, 0], sizes = [1, 16], strides = [1, 1]} : vector<4x16xf32> to vector<1x16xf32>
    %71 = vector.extract_strided_slice %0 {offsets = [2, 0], sizes = [1, 16], strides = [1, 1]} : vector<4x16xf32> to vector<1x16xf32>
    %72 = vector.extract_strided_slice %0 {offsets = [3, 0], sizes = [1, 16], strides = [1, 1]} : vector<4x16xf32> to vector<1x16xf32>
    %cst_19 = arith.constant 26.8578777 : f32
    %73 = vector.broadcast %cst_19 : f32 to vector<1x16xf32>
    %74 = arith.mulf %68, %73 : vector<1x16xf32>
    %75 = arith.addf %70, %74 : vector<1x16xf32>
    %cst_20 = arith.constant -0.00205869577 : f32
    %76 = vector.broadcast %cst_20 : f32 to vector<1x16xf32>
    %77 = arith.mulf %75, %76 : vector<1x16xf32>
    %78 = arith.mulf %68, %68 : vector<1x16xf32>
    %79 = arith.mulf %78, %64 : vector<1x16xf32>
    %80 = arith.subf %69, %79 : vector<1x16xf32>
    %cst_21 = arith.constant 0.0151680429 : f32
    %81 = vector.broadcast %cst_21 : f32 to vector<1x16xf32>
    %82 = arith.mulf %80, %81 : vector<1x16xf32>
    %83 = arith.subf %82, %66 : vector<1x16xf32>
    %cst_22 = arith.constant -0.104505077 : f32
    %84 = vector.broadcast %cst_22 : f32 to vector<1x16xf32>
    %85 = arith.mulf %83, %84 : vector<1x16xf32>
    %cst_23 = arith.constant 0.0279316381 : f32
    %86 = vector.broadcast %cst_23 : f32 to vector<1x16xf32>
    %87 = arith.mulf %70, %86 : vector<1x16xf32>
    %88 = arith.subf %68, %87 : vector<1x16xf32>
    %89 = arith.addf %88, %66 : vector<1x16xf32>
    %cst_24 = arith.constant 0.075265266 : f32
    %90 = vector.broadcast %cst_24 : f32 to vector<1x16xf32>
    %91 = arith.mulf %89, %90 : vector<1x16xf32>
    %92 = arith.mulf %72, %72 : vector<1x16xf32>
    %93 = arith.subf %92, %66 : vector<1x16xf32>
    %94 = arith.addf %93, %71 : vector<1x16xf32>
    %95 = arith.subf %94, %72 : vector<1x16xf32>
    %cst_25 = arith.constant -0.339280456 : f32
    %96 = vector.broadcast %cst_25 : f32 to vector<1x16xf32>
    %97 = arith.mulf %68, %96 : vector<1x16xf32>
    %98 = arith.addf %95, %97 : vector<1x16xf32>
    %cst_26 = arith.constant -0.0855490416 : f32
    %99 = vector.broadcast %cst_26 : f32 to vector<1x16xf32>
    %100 = arith.mulf %98, %99 : vector<1x16xf32>
    %101 = arith.addf %77, %100 : vector<1x16xf32>
    %102 = arith.addf %101, %77 : vector<1x16xf32>
    %cst_27 = arith.constant -0.243267626 : f32
    %103 = vector.broadcast %cst_27 : f32 to vector<1x16xf32>
    %104 = arith.mulf %102, %103 : vector<1x16xf32>
    %cst_28 = arith.constant 1.36962187 : f32
    %105 = vector.broadcast %cst_28 : f32 to vector<1x16xf32>
    %106 = arith.mulf %85, %105 : vector<1x16xf32>
    %107 = arith.subf %104, %106 : vector<1x16xf32>
    %cst_29 = arith.constant 1.12346148 : f32
    %108 = vector.broadcast %cst_29 : f32 to vector<1x16xf32>
    %109 = arith.mulf %91, %108 : vector<1x16xf32>
    %110 = arith.subf %107, %109 : vector<1x16xf32>
    %111 = arith.addf %85, %77 : vector<1x16xf32>
    %112 = arith.subf %91, %111 : vector<1x16xf32>
    %113 = arith.addf %112, %100 : vector<1x16xf32>
    %114 = tpu.concatenate %110, %113 in 0 : vector<1x16xf32>, vector<1x16xf32> -> vector<2x16xf32>
    %c0_30 = arith.constant 0 : index
    %c0_31 = arith.constant 0 : index
    %115 = vector.load %arg4[%c0_30, %c0_31] : memref<2x16xf32, #tpu.memory_space<vmem>>, vector<2x16xf32>
    tpu.vector_store %arg4[%c0_30, %c0_31], %114 {strides = array<i32>} : memref<2x16xf32, #tpu.memory_space<vmem>>, vector<2x16xf32>,
    return
  }
  func.func @transform_0(%arg0: i32) -> (i32, i32) {
    %c0_i32 = arith.constant 0 : i32
    %c0_i32_0 = arith.constant 0 : i32
    %c0_i32_1 = arith.constant 0 : i32
    return %c0_i32, %c0_i32_0 : i32, i32
  }
  func.func @transform_1(%arg0: i32) -> (i32, i32) {
    %c0_i32 = arith.constant 0 : i32
    %c0_i32_0 = arith.constant 0 : i32
    %c0_i32_1 = arith.constant 0 : i32
    return %c0_i32, %c0_i32_0 : i32, i32
  }
  func.func @transform_2(%arg0: i32) -> (i32, i32) {
    %c0_i32 = arith.constant 0 : i32
    %c0_i32_0 = arith.constant 0 : i32
    %c0_i32_1 = arith.constant 0 : i32
    return %c0_i32, %c0_i32_0 : i32, i32
  }
  func.func @transform_3(%arg0: i32) -> (i32, i32) {
    %c0_i32 = arith.constant 0 : i32
    %c0_i32_0 = arith.constant 0 : i32
    %c0_i32_1 = arith.constant 0 : i32
    return %c0_i32, %c0_i32_0 : i32, i32
  }
}

</mosaic_0001>

<bundles_post_ra>
// kernel: tpu_custom_call.1
= control target key start
LH: loop header
LB: loop body
LE: loop exit
PB: predicated region body
PF: predicated region fallthrough
CT: control target
= control target key end

     0   :  { %8 = vsyncpa [#allocation3], 0  ;;  %s609_s0 = inlined_call_operand.hbm [shape: f32[4,16], index: 0, kind: input, shape index: {}]   ;;  %s610_s1 = inlined_call_operand.vmem [shape: s32[1,32], index: 1, kind: input, shape index: {}]   ;;  %s611_s2 = inlined_call_operand.vmem [shape: s32[1,32], index: 2, kind: input, shape index: {}]   ;;  %s612_s3 = inlined_call_operand.hbm [shape: f32[2,16], index: 3, kind: output, shape index: {}]  }
   0x1   :  { %9 = vsyncpa [#allocation4], 0  ;;  %s534_s12 = smov [#allocation2]   ;;  %s486_s16 = scalar_lea.hbm %s609_s0, 64 }
   0x2   :  { %s16_s13 = sshll.u32 %s534_s12, 4  ;;  %p487_p0 = scmp.ne.s32.totalorder %s609_s0, %s486_s16  ;;  %s17_s13 = int_to_ptr.vmem [resolvable:$true] %s16_s13 }
   0x3   :  { %p490_p1 = scmp.lt.u32.totalorder %s486_s16, %s609_s0 }
   0x5   :  { %p492_p2 = pnand %p490_p1, %p487_p0 }
   0x7   :  { %495 = shalt.err (!%p492_p2)
}
   0x8   :  { %s496_s21 = scalar_lea.vmem %s17_s13, 64  ;;  %p501_p4 = scmp.lt.s32.totalorder %s17_s13, %s17_s13 }
   0x9   :  { %p497_p3 = scmp.ne.s32.totalorder %s17_s13, %s496_s21  ;;  %p502_p5 = scmp.lt.s32.totalorder %s496_s21, %s496_s21 }
   0xb   :  { %p503_p6 = por %p502_p5, %p501_p4 }
   0xd   :  { %p504_p7 = pnand %p503_p6, %p497_p3 }
   0xf   :  { %507 = shalt.err (!%p504_p7)
}
  0x10   :  { %19 = dma.hbm_to_vmem [thread:$0]  %s609_s0, 64, %s17_s13, [#allocation3]  }
  0x11   :  { %530 = dma.done.wait [#allocation3], 64  }
  0x12   :  { %531 = vsyncadd [#allocation3], 4294967232  ;;  %v30_v0 = vlaneseq  ;;  %v535_v1 = vmov 0.0|0.0   ;;  %vm536_vm0 = vmmov 0   ;;  %v537_v3 = vmov 0.0  }
  0x13   :  { %468 = vmatprep.subr.bf16.mxu1 %v535_v1  ;;  %474 = vmatprep.subr.bf16.mxu0 %v535_v1  ;;  %v422_v5 = vld [vmem:[%s611_s2] ss:$0 sm:$0xff]  ;;  %v538_v7 = vmov 1.0|1.0   ;;  %vm53_vm6 = vcmask 130048   ;;  %vm253_vm8 = vcmask 261120  }
  0x14   :  { %v31_v2 = vshrl.u32 %v30_v0, 7  ;;  %451 = vmatprep.mubr.msk.f32.mxu1 %vm536_vm0, %v537_v3  ;;  %465 = vmatprep.mubr.msk.f32.mxu0 %vm536_vm0, %v537_v3  ;;  %v425_v6 = vld [vmem:[%s610_s1] ss:$0 sm:$0xff]  ;;  %vm476_vm9 = vmpackc.low %vm253_vm8, %vm253_vm8  ;;  %vm247_vm11 = vcmask 1040384   ;;  %vm249_vm12 = vcmask 1041408   ;;  %vm251_vm13 = vcmask 1042432  }
  0x15   :  { %v580_v8 = vld [vmem:[#allocation2] sm:$0xf]  ;;  %s539_s1 = smov [#allocation5]   ;;  %vm405_vm14 = vcmask 123904  }
  0x16   :  { %v32_v4 = vadd.s32 8, %v31_v2  ;;  %vm37_vm1 = vcmp.eq.s32.totalorder %v31_v2, %v422_v5  ;;  %vm47_vm3 = vcmp.eq.s32.totalorder %v31_v2, %v425_v6  ;;  %v365_v57 = vmul.f32 %v580_v8, %v580_v8  ;;  %s413_s2 = sshll.u32 %s539_s1, 4  ;;  %s414_s2 = int_to_ptr.vmem [resolvable:$true] %s413_s2 }
  0x17   :  { %v423_v9 = vsel %vm37_vm1, 1.0, %v537_v3  ;;  %v369_v62 = vrot.slane %v580_v8, 7  ;;  %s508_s27 = scalar_lea.vmem %s414_s2, 32  ;;  %p513_p9 = scmp.lt.s32.totalorder %s414_s2, %s414_s2 }
  0x18   :  { %vm38_vm2 = vcmp.eq.s32.totalorder %v32_v4, %v422_v5  ;;  %vm48_vm4 = vcmp.eq.s32.totalorder %v32_v4, %v425_v6  ;;  %v358_v4 = vmul.f32 0.027931638, %v580_v8  ;;  %p509_p8 = scmp.ne.s32.totalorder %s414_s2, %s508_s27  ;;  %p514_p10 = scmp.lt.s32.totalorder %s508_s27, %s508_s27 }
  0x19   :  { %vm469_vm5 = vmpackc.low %vm38_vm2, %vm37_vm1  ;;  %v424_v10 = vsel %vm38_vm2, 1.0, %v537_v3 }
  0x1a   :  { %470 = vmatpush3.bf16.msk.msra.mxu1 %vm469_vm5, %v538_v7  ;;  %vm472_vm7 = vmpackc.low %vm48_vm4, %vm47_vm3  ;;  %v475_v11 = vpack.c.bf16 %v424_v10, %v423_v9  ;;  %p515_p11 = por %p514_p10, %p513_p9 }
  0x1b   :  { %471 = vmatprep.subr.bf16.mxu1 %v535_v1 }
  0x1c   :  { %477 = vmatpush3.bf16.xpose.msk.msra.mxu0 %vm476_vm9, %v475_v11  ;;  %p516_p12 = pnand %p515_p11, %p509_p8 }
  0x1d   :  { %452 = vmatmul.mubr.msk.f32.vlgmr.msra.gmra.mrb[0].mxu1 %vm53_vm6, %v580_v8 }
  0x1e   :  { %473 = vmatpush3.bf16.msk.msra.mxu1 %vm472_vm7, %v538_v7  ;;  %458 = vmatprep.mubr.msk.f32.mxu1 %vm536_vm0, %v537_v3 }
  0x21   :  { %459 = vmatmul.mubr.msk.f32.vlgmr.msra.gmra.mrb[2].mxu1 %vm53_vm6, %v580_v8 }
  0xf0   :  { %v123_v12 = vpop.f32.mrb[0].mxu1 }
  0xf1   :  { %v213_v13 = vmul.f32 0.20244296, %v123_v12  ;;  %v453_v14 = vpop.f32.mrb[1].mxu1  ;;  %v211_v15 = vmul.f32 0.95594215, %v123_v12 }
  0xf3   :  { %v215_v16 = vrot.slane %v213_v13, 7 }
  0xf4   :  { %v193_v17 = vpop.f32.mrb[2].mxu1 }
  0xf5   :  { %v197_v18 = vsub.f32 %v193_v17, %v123_v12  ;;  %v198_v19 = vsub.f32 %v123_v12, %v193_v17  ;;  %v212_v20 = vsub.f32 %v211_v15, %v193_v17  ;;  %v218_v21 = vmul.f32 -0.17809269, %v193_v17  ;;  %v460_v22 = vpop.f32.mrb[3].mxu1 }
  0xf7   :  { %v199_v23 = vmul.f32 0.40914905, %v198_v19  ;;  %v205_v24 = vmul.f32 0.5819344, %v198_v19  ;;  %v217_v25 = vsub.f32 %v212_v20, %v215_v16  ;;  %v220_v26 = vrot.slane %v218_v21, 7 }
  0xf8   :  { %vm224_vm10 = vcmp.ne.f32.partialorder %v198_v19, 0.0 }
  0xf9   :  { %v201_v27 = vrot.slane %v199_v23, 1  ;;  %v207_v28 = vrot.slane %v205_v24, 1  ;;  %v222_v29 = vsub.f32 %v217_v25, %v220_v26  ;;  %v434_v30 = vsel %vm224_vm10, 1.0, %v537_v3 }
  0xfa   :  { %v228_v31 = vrot.slane %v434_v30, 1 }
  0xfb   :  { %v203_v32 = vadd.f32 %v201_v27, %v197_v18  ;;  %v209_v33 = vadd.f32 %v207_v28, %v197_v18  ;;  %v223_v39 = vmul.f32 0.026933579, %v222_v29 }
  0xfc   :  { %v230_v34 = vmax.f32 %v434_v30, %v228_v31 }
  0xfd   :  { %v204_v36 = vmul.f32 0.028998906, %v203_v32  ;;  %v210_v37 = vmul.f32 -0.02637788, %v209_v33 }
  0xfe   :  { %v232_v35 = vrot.slane %v230_v34, 2 }
 0x100   :  { %v234_v38 = vmax.f32 %v230_v34, %v232_v35 }
 0x102   :  { %v235_v40 = vmul.f32 %v234_v38, %v204_v36  ;;  %v236_v41 = vmul.f32 %v234_v38, %v210_v37  ;;  %v238_v42 = vrot.slane %v234_v38, 7 }
 0x104   :  { %v242_v43 = vrot.slane %v236_v41, 7  ;;  %v240_v44 = vmul.f32 %v238_v42, %v223_v39 }
 0x106   :  { %v245_v45 = vrot.slane %v240_v44, 7  ;;  %v248_v46 = vsel %vm247_vm11, %v235_v40, %v242_v43 }
 0x108   :  { %v250_v47 = vsel %vm249_vm12, %v248_v46, %v245_v45 }
 0x109   :  { %v252_v48 = vsel %vm251_vm13, %v250_v47, 1.0 }
 0x10a   :  { %466 = vmatmul.mubr.msk.f32.vlgmr.msra.gmra.mrb[0].mxu0 %vm253_vm8, %v252_v48 }
 0x1dd   :  { %v329_v49 = vpop.f32.mrb[0].mxu0 }
 0x1de   :  { %v333_v50 = vmax.f32 %v329_v49, 1.0  ;;  %v467_v51 = vpop.f32.mrb[1].mxu0  ;;  %v348_v60 = vrot.slane %v329_v49, 1 }
 0x1e0   :  { %484 = vrcp.f32 %v333_v50 }
 0x1ea   :  { %v485_v52 = vpop.eup %484 }
 0x1eb   :  { %v337_v53 = vrot.slane %v485_v52, 3  ;;  %v340_v54 = vrot.slane %v485_v52, 2 }
 0x1ed   :  { %v339_v55 = vmul.f32 %v337_v53, %v329_v49  ;;  %v342_v56 = vmul.f32 %v340_v54, %v329_v49 }
 0x1ef   :  { %v343_v58 = vmul.f32 26.857878, %v342_v56  ;;  %v346_v59 = vmul.f32 %v342_v56, %v342_v56  ;;  %v366_v61 = vrot.slane %v339_v55, 5  ;;  %v373_v1 = vmul.f32 -0.33928046, %v342_v56 }
 0x1f0   :  { %v359_v12 = vsub.f32 %v342_v56, %v358_v4  ;;  %v361_v13 = vrot.slane %v339_v55, 7 }
 0x1f1   :  { %v350_v63 = vmul.f32 %v348_v60, %v346_v59  ;;  %v368_v0 = vsub.f32 %v365_v57, %v366_v61  ;;  %v344_v2 = vadd.f32 %v343_v58, %v580_v8  ;;  %v375_v9 = vrot.slane %v373_v1, 6 }
 0x1f2   :  { %v363_v19 = vadd.f32 %v361_v13, %v359_v12 }
 0x1f3   :  { %v352_v3 = vrot.slane %v350_v63, 1  ;;  %v371_v5 = vadd.f32 %v369_v62, %v368_v0  ;;  %v345_v10 = vmul.f32 -0.0020586958, %v344_v2 }
 0x1f4   :  { %v364_v24 = vmul.f32 0.075265266, %v363_v19 }
 0x1f5   :  { %v354_v6 = vsub.f32 %v580_v8, %v352_v3  ;;  %v372_v7 = vsub.f32 %v371_v5, %v580_v8  ;;  %v393_v18 = vrot.slane %v345_v10, 1 }
 0x1f6   :  { %v390_v29 = vmul.f32 1.1234615, %v364_v24 }
 0x1f7   :  { %v355_v11 = vmul.f32 0.015168043, %v354_v6  ;;  %v377_v14 = vadd.f32 %v375_v9, %v372_v7 }
 0x1f9   :  { %v356_v15 = vsub.f32 %v355_v11, %v339_v55  ;;  %v378_v16 = vmul.f32 -0.08554904, %v377_v14 }
 0x1fb   :  { %v357_v17 = vmul.f32 -0.10450508, %v356_v15  ;;  %v380_v20 = vrot.slane %v378_v16, 2 }
 0x1fd   :  { %v395_v21 = vadd.f32 %v393_v18, %v357_v17  ;;  %v385_v22 = vmul.f32 1.3696219, %v357_v17  ;;  %v382_v23 = vadd.f32 %v380_v20, %v345_v10 }
 0x1ff   :  { %v383_v25 = vadd.f32 %v382_v23, %v345_v10  ;;  %v397_v26 = vrot.slane %v395_v21, 7  ;;  %v387_v8 = vrot.slane %v385_v22, 7 }
 0x201   :  { %v384_v27 = vmul.f32 -0.24326763, %v383_v25  ;;  %v399_v30 = vsub.f32 %v364_v24, %v397_v26 }
 0x203   :  { %v389_v28 = vsub.f32 %v384_v27, %v387_v8  ;;  %v400_v32 = vadd.f32 %v399_v30, %v380_v20 }
 0x205   :  { %v391_v31 = vsub.f32 %v389_v28, %v390_v29 }
 0x207   :  { %v402_v33 = vrot.slane %v391_v31, 1 }
 0x209   :  { %v404_v34 = vsel %vm247_vm11, %v402_v33, %v400_v32 }
 0x20a   :  { %406 = vst.msk [vmem:[#allocation5] sm:$0x3] %vm405_vm14, %v404_v34 }
 0x20b   :  { %519 = shalt.err (!%p516_p12)
}
 0x20c   :  { %s520_s30 = scalar_lea.hbm %s612_s3, 32 }
 0x20d   :  { %p521_p13 = scmp.ne.s32.totalorder %s612_s3, %s520_s30  ;;  %p524_p0 = scmp.lt.u32.totalorder %s520_s30, %s612_s3 }
 0x20f   :  { %p526_p1 = pnand %p524_p0, %p521_p13 }
 0x211   :  { %529 = shalt.err (!%p526_p1)
}
 0x212   :  { %416 = dma.vmem_to_hbm [thread:$0]  %s414_s2, 32, %s612_s3, [#allocation4]  }
 0x213   :  { %532 = dma.done.wait [#allocation4], 32  }
 0x214   :  { %533 = vsyncadd [#allocation4], 4294967264 }
 0x215   :  { %420 = vsyncpa [#allocation3], 1 }
 0x216   :  { %421 = vsyncpa [#allocation4], 1 }

</bundles_post_ra>
